<compile_context>
chip_gen: v7x
topology: tpu7x:2x2x1
jax: 0.10.0
libtpu: 0.0.40
codegen_flags: <defaults>
</compile_context>

<pallas_src>
import jax
import jax.numpy as jnp
from jax import lax
from jax.experimental import pallas as pl
from jax.experimental.pallas import tpu as pltpu


def _lstm_kernel(x_ref, w_cat_ref, b_ref, h_out_ref):
    """Sequential LSTM recurrence, whole sequence in one invocation.

    x_ref     : (T, B, E)   bf16  time-major inputs (whole sequence, VMEM-resident)
    w_cat_ref : (E+H, 4H)   bf16  fused [W_ih^T ; W_hh^T]
    b_ref     : (1, 4H)     f32   combined gate bias (b_ih + b_hh)
    h_out_ref : (T, B, H)   bf16  hidden state for every timestep
    """
    T, B, _ = x_ref.shape
    H = h_out_ref.shape[2]

    def step(t, carry):
        h, c = carry                                        # f32 [B, H]
        x_t = x_ref[pl.ds(t, 1), :, :][0]                   # bf16 [B, E]
        xh = jnp.concatenate([x_t, h.astype(jnp.bfloat16)], axis=-1)
        gates = (jnp.dot(xh, w_cat_ref[...],
                         preferred_element_type=jnp.float32)
                 + b_ref[...])                              # f32 [B, 4H]
        # PyTorch LSTM gate order: input, forget, cell(g), output.
        i_g = jax.nn.sigmoid(gates[:, 0 * H:1 * H])
        f_g = jax.nn.sigmoid(gates[:, 1 * H:2 * H])
        g_g = jnp.tanh(gates[:, 2 * H:3 * H])
        o_g = jax.nn.sigmoid(gates[:, 3 * H:4 * H])
        c_new = f_g * c + i_g * g_g
        h_new = o_g * jnp.tanh(c_new)
        h_out_ref[pl.ds(t, 1), :, :] = h_new.astype(h_out_ref.dtype)[None]
        return h_new, c_new

    init = (jnp.zeros((B, H), jnp.float32), jnp.zeros((B, H), jnp.float32))
    lax.fori_loop(0, T, step, init, unroll=True)


def _proj_kernel(h_ref, w_ref, b_ref, o_ref):
    """One (tm, tn) tile of: logits = hiddens @ W_out^T + b_out."""
    o_ref[...] = (jnp.dot(h_ref[...], w_ref[...],
                          preferred_element_type=jnp.float32)
                  + b_ref[...])


def _largest_tile(dim, candidates):
    for c in candidates:
        if dim % c == 0:
            return c
    return dim


@jax.jit
def decoder_rnn_forward(features, captions, params):
    """features: [B, E] f32; captions: [B, S] int32 -> logits [B, S, V] f32."""
    emb_table = params["embed"]        # [V, E]
    w_cat_T = params["w_cat_T"]        # [E+H, 4H]  (= [W_ih^T ; W_hh^T])
    b_gates = params["b_gates"]        # [1, 4H]
    w_out_T = params["w_out_T"]        # [H, V]
    b_out = params["b_out"]            # [1, V]

    # ---- glue (plain XLA): embedding gather, eval-mode dropout (= identity),
    #      feature/caption concat, batch-first -> time-major -----------------
    embeddings = emb_table[captions]                                   # [B, S, E]
    inputs = jnp.concatenate([features[:, None, :], embeddings[:, :-1, :]],
                             axis=1)                                   # [B, S, E]
    x_tm = jnp.transpose(inputs, (1, 0, 2))                            # [T, B, E]

    T, B, E = x_tm.shape
    H = w_out_T.shape[0]
    V = w_out_T.shape[1]
    fourH = 4 * H

    # Pad batch to a multiple of 8 (sublane width); padded rows are discarded.
    B_pad = max(8, -(-B // 8) * 8)
    if B_pad != B:
        x_tm = jnp.pad(x_tm, ((0, 0), (0, B_pad - B), (0, 0)))

    # bf16 matmul operands (2x MXU throughput, half the resident weight VMEM);
    # gate math / cell state stay f32 inside the kernel.
    x_bf16 = x_tm.astype(jnp.bfloat16)
    w_cat_bf16 = w_cat_T.astype(jnp.bfloat16)
    w_out_bf16 = w_out_T.astype(jnp.bfloat16)

    # ---- kernel 1: LSTM recurrence -> hiddens [T, B_pad, H] (bf16) ---------
    hiddens = pl.pallas_call(
        _lstm_kernel,
        out_shape=jax.ShapeDtypeStruct((T, B_pad, H), jnp.bfloat16),
        grid=(1,),
        in_specs=[
            pl.BlockSpec((T, B_pad, E), lambda i: (0, 0, 0)),
            pl.BlockSpec((E + H, fourH), lambda i: (0, 0)),
            pl.BlockSpec((1, fourH), lambda i: (0, 0)),
        ],
        out_specs=pl.BlockSpec((T, B_pad, H), lambda i: (0, 0, 0)),
        compiler_params=pltpu.CompilerParams(
            dimension_semantics=("arbitrary",),
            vmem_limit_bytes=32 * 1024 * 1024),
    )(x_bf16, w_cat_bf16, b_gates)

    # ---- kernel 2: hoisted output projection as ONE tiled matmul -----------
    M = T * B_pad                                   # multiple of 8 by construction
    hid_flat = hiddens.reshape(M, H)
    tm = _largest_tile(M, (512, 256, 128, 64, 32, 16, 8))
    tn = _largest_tile(V, (512, 256, 128))          # falls back to full V
    logits_flat = pl.pallas_call(
        _proj_kernel,
        out_shape=jax.ShapeDtypeStruct((M, V), jnp.float32),
        grid=(M // tm, V // tn),
        in_specs=[
            pl.BlockSpec((tm, H), lambda m, n: (m, 0)),
            pl.BlockSpec((H, tn), lambda m, n: (0, n)),
            pl.BlockSpec((1, tn), lambda m, n: (0, n)),
        ],
        out_specs=pl.BlockSpec((tm, tn), lambda m, n: (m, n)),
        compiler_params=pltpu.CompilerParams(
            dimension_semantics=("parallel", "parallel"),
            vmem_limit_bytes=32 * 1024 * 1024),
    )(hid_flat, w_out_bf16, b_out)

    logits = logits_flat.reshape(T, B_pad, V)[:, :B, :]   # drop batch padding
    return jnp.transpose(logits, (1, 0, 2))               # [B, S, V]


def init_params(key, embed_size, hidden_size, vocab_size):
    """Deterministic init matching PyTorch default shapes (uniform +-1/sqrt(H))."""
    k_emb, k_wih, k_whh, k_bih, k_bhh, k_wo, k_bo = jax.random.split(key, 7)
    H = hidden_size
    scale = 1.0 / jnp.sqrt(jnp.float32(H))
    w_ih_T = jax.random.uniform(k_wih, (embed_size, 4 * H), jnp.float32, -scale, scale)
    w_hh_T = jax.random.uniform(k_whh, (hidden_size, 4 * H), jnp.float32, -scale, scale)
    return {
        "embed": jax.random.normal(k_emb, (vocab_size, embed_size), jnp.float32),
        # Fused [W_ih^T ; W_hh^T] -> single gate matmul per timestep.
        "w_cat_T": jnp.concatenate([w_ih_T, w_hh_T], axis=0),          # [E+H, 4H]
        "b_gates": (jax.random.uniform(k_bih, (1, 4 * H), jnp.float32, -scale, scale)
                    + jax.random.uniform(k_bhh, (1, 4 * H), jnp.float32, -scale, scale)),
        "w_out_T": jax.random.uniform(k_wo, (hidden_size, vocab_size), jnp.float32,
                                      -scale, scale),
        "b_out": jax.random.uniform(k_bo, (1, vocab_size), jnp.float32, -scale, scale),
    }


def _reference_forward(features, captions, params):
    """Pure-JAX reference (lax.scan LSTM) with the same bf16-operand matmul semantics."""
    emb = params["embed"][captions]
    inputs = jnp.concatenate([features[:, None, :], emb[:, :-1, :]], axis=1)
    x_tm = jnp.transpose(inputs, (1, 0, 2)).astype(jnp.bfloat16)       # [T, B, E]
    T, B, _ = x_tm.shape
    H = params["w_out_T"].shape[0]
    w_cat = params["w_cat_T"].astype(jnp.bfloat16)
    w_out = params["w_out_T"].astype(jnp.bfloat16)

    def step(carry, x):
        h, c = carry
        xh = jnp.concatenate([x, h.astype(jnp.bfloat16)], axis=-1)
        gates = (jnp.dot(xh, w_cat, preferred_element_type=jnp.float32)
                 + params["b_gates"])
        i = jax.nn.sigmoid(gates[:, 0 * H:1 * H])
        f = jax.nn.sigmoid(gates[:, 1 * H:2 * H])
        g = jnp.tanh(gates[:, 2 * H:3 * H])
        o = jax.nn.sigmoid(gates[:, 3 * H:4 * H])
        c_new = f * c + i * g
        h_new = o * jnp.tanh(c_new)
        return (h_new, c_new), h_new.astype(jnp.bfloat16)

    init = (jnp.zeros((B, H), jnp.float32), jnp.zeros((B, H), jnp.float32))
    _, hiddens = lax.scan(step, init, x_tm)                            # [T, B, H] bf16
    out = (jnp.dot(hiddens.reshape(-1, H), w_out,
                   preferred_element_type=jnp.float32)
           + params["b_out"]).reshape(T, B, -1)                        # [T, B, V]
    return jnp.transpose(out, (1, 0, 2))


if __name__ == "__main__":
    embed_size, hidden_size, vocab_size = 32, 32, 128
    batch, seq_len = 2, 8

    key = jax.random.PRNGKey(0)
    k_params, k_feat, k_cap = jax.random.split(key, 3)

    params = init_params(k_params, embed_size, hidden_size, vocab_size)
    features = jax.random.normal(k_feat, (batch, embed_size), jnp.float32)
    captions = jax.random.randint(k_cap, (batch, seq_len), 0, vocab_size, jnp.int32)

    out = decoder_rnn_forward(features, captions, params)
    out = jax.block_until_ready(out)

    ref = _reference_forward(features, captions, params)
    assert out.shape == (batch, seq_len, vocab_size), out.shape
    assert jnp.allclose(out, ref, atol=2e-3, rtol=2e-3), "mismatch vs JAX reference"

    print("KERNEL_OK")
</pallas_src>

<mosaic_0001>
module attributes {stable_mosaic.version = 11 : i64} {
  func.func @_proj_kernel(%arg0: i32, %arg1: i32, %arg2: memref<64x32xbf16, #tpu.memory_space<vmem>>, %arg3: memref<32x128xbf16, #tpu.memory_space<vmem>>, %arg4: memref<1x128xf32, #tpu.memory_space<vmem>>, %arg5: memref<64x128xf32, #tpu.memory_space<vmem>>) attributes {dimension_semantics = [#tpu.dimension_semantics<parallel>, #tpu.dimension_semantics<parallel>], iteration_bounds = array<i64: 1, 1>, scalar_prefetch = 0 : i64, scratch_operands = 0 : i64, tpu.core_type = #tpu.core_type<tc>, window_params = [{transform_indices = @transform_0, window_bounds = array<i64: 64, 32>}, {transform_indices = @transform_1, window_bounds = array<i64: 32, 128>}, {transform_indices = @transform_2, window_bounds = array<i64: 1, 128>}, {transform_indices = @transform_3, window_bounds = array<i64: 64, 128>}]} {
    %c0 = arith.constant 0 : index
    %c0_0 = arith.constant 0 : index
    %0 = vector.load %arg2[%c0, %c0_0] : memref<64x32xbf16, #tpu.memory_space<vmem>>, vector<64x32xbf16>
    %c0_1 = arith.constant 0 : index
    %c0_2 = arith.constant 0 : index
    %1 = vector.load %arg3[%c0_1, %c0_2] : memref<32x128xbf16, #tpu.memory_space<vmem>>, vector<32x128xbf16>
    %cst = arith.constant dense<0.000000e+00> : vector<64x128xf32>
    %2 = tpu.matmul %0, %1, %cst {dimension_numbers = #tpu.dot_dimension_numbers<[1], [0], [0], [1], [0, 0, 1, 1], [], []>} : vector<64x32xbf16>, vector<32x128xbf16>, vector<64x128xf32> -> vector<64x128xf32>
    %c0_3 = arith.constant 0 : index
    %c0_4 = arith.constant 0 : index
    %3 = vector.load %arg4[%c0_3, %c0_4] : memref<1x128xf32, #tpu.memory_space<vmem>>, vector<1x128xf32>
    %4 = vector.broadcast %3 : vector<1x128xf32> to vector<64x128xf32>
    %5 = arith.addf %2, %4 : vector<64x128xf32>
    %c0_5 = arith.constant 0 : index
    %c0_6 = arith.constant 0 : index
    %6 = vector.load %arg5[%c0_5, %c0_6] : memref<64x128xf32, #tpu.memory_space<vmem>>, vector<64x128xf32>
    tpu.vector_store %arg5[%c0_5, %c0_6], %5 {strides = array<i32>} : memref<64x128xf32, #tpu.memory_space<vmem>>, vector<64x128xf32>,
    return
  }
  func.func @transform_0(%arg0: i32, %arg1: i32) -> (i32, i32) {
    %c0_i32 = arith.constant 0 : i32
    %c0_i32_0 = arith.constant 0 : i32
    return %arg0, %c0_i32 : i32, i32
  }
  func.func @transform_1(%arg0: i32, %arg1: i32) -> (i32, i32) {
    %c0_i32 = arith.constant 0 : i32
    %c0_i32_0 = arith.constant 0 : i32
    return %c0_i32, %arg1 : i32, i32
  }
  func.func @transform_2(%arg0: i32, %arg1: i32) -> (i32, i32) {
    %c0_i32 = arith.constant 0 : i32
    %c0_i32_0 = arith.constant 0 : i32
    return %c0_i32, %arg1 : i32, i32
  }
  func.func @transform_3(%arg0: i32, %arg1: i32) -> (i32, i32) {
    %c0_i32 = arith.constant 0 : i32
    return %arg0, %arg1 : i32, i32
  }
}

module attributes {stable_mosaic.version = 11 : i64} {
  func.func @_lstm_kernel(%arg0: i32, %arg1: memref<8x8x32xbf16, #tpu.memory_space<vmem>>, %arg2: memref<64x128xbf16, #tpu.memory_space<vmem>>, %arg3: memref<1x128xf32, #tpu.memory_space<vmem>>, %arg4: memref<8x8x32xbf16, #tpu.memory_space<vmem>>) attributes {dimension_semantics = [#tpu.dimension_semantics<arbitrary>], iteration_bounds = array<i64: 1>, scalar_prefetch = 0 : i64, scratch_operands = 0 : i64, tpu.core_type = #tpu.core_type<tc>, window_params = [{pipeline_mode = #tpu.pipeline_mode<synchronous>, transform_indices = @transform_0, window_bounds = array<i64: 8, 8, 32>}, {pipeline_mode = #tpu.pipeline_mode<synchronous>, transform_indices = @transform_1, window_bounds = array<i64: 64, 128>}, {pipeline_mode = #tpu.pipeline_mode<synchronous>, transform_indices = @transform_2, window_bounds = array<i64: 1, 128>}, {pipeline_mode = #tpu.pipeline_mode<synchronous>, transform_indices = @transform_3, window_bounds = array<i64: 8, 8, 32>}]} {
    %cst = arith.constant 0.000000e+00 : f32
    %0 = vector.broadcast %cst : f32 to vector<8x32xf32>
    %cst_0 = arith.constant 0.000000e+00 : f32
    %1 = vector.broadcast %cst_0 : f32 to vector<8x32xf32>
    %c0_i32 = arith.constant 0 : i32
    %2 = arith.index_cast %c0_i32 : i32 to index
    %c0 = arith.constant 0 : index
    %c0_1 = arith.constant 0 : index
    %3 = vector.load %arg1[%2, %c0, %c0_1] : memref<8x8x32xbf16, #tpu.memory_space<vmem>>, vector<1x8x32xbf16>
    %4 = vector.shape_cast %3 : vector<1x8x32xbf16> to vector<8x32xbf16>
    %5 = arith.truncf %0 : vector<8x32xf32> to vector<8x32xbf16>
    %6 = tpu.concatenate %4, %5 in 1 : vector<8x32xbf16>, vector<8x32xbf16> -> vector<8x64xbf16>
    %c0_2 = arith.constant 0 : index
    %c0_3 = arith.constant 0 : index
    %7 = vector.load %arg2[%c0_2, %c0_3] : memref<64x128xbf16, #tpu.memory_space<vmem>>, vector<64x128xbf16>
    %cst_4 = arith.constant dense<0.000000e+00> : vector<8x128xf32>
    %8 = tpu.matmul %6, %7, %cst_4 {dimension_numbers = #tpu.dot_dimension_numbers<[1], [0], [0], [1], [0, 0, 1, 1], [], []>} : vector<8x64xbf16>, vector<64x128xbf16>, vector<8x128xf32> -> vector<8x128xf32>
    %c0_5 = arith.constant 0 : index
    %c0_6 = arith.constant 0 : index
    %9 = vector.load %arg3[%c0_5, %c0_6] : memref<1x128xf32, #tpu.memory_space<vmem>>, vector<1x128xf32>
    %10 = vector.broadcast %9 : vector<1x128xf32> to vector<8x128xf32>
    %11 = arith.addf %8, %10 : vector<8x128xf32>
    %12 = vector.extract_strided_slice %11 {offsets = [0, 0], sizes = [8, 32], strides = [1, 1]} : vector<8x128xf32> to vector<8x32xf32>
    %13 = arith.negf %12 : vector<8x32xf32>
    %14 = math.exp %13 : vector<8x32xf32>
    %cst_7 = arith.constant 1.000000e+00 : f32
    %15 = vector.broadcast %cst_7 : f32 to vector<8x32xf32>
    %16 = arith.addf %15, %14 : vector<8x32xf32>
    %17 = arith.divf %15, %16 : vector<8x32xf32>
    %18 = vector.extract_strided_slice %11 {offsets = [0, 32], sizes = [8, 32], strides = [1, 1]} : vector<8x128xf32> to vector<8x32xf32>
    %19 = arith.negf %18 : vector<8x32xf32>
    %20 = math.exp %19 : vector<8x32xf32>
    %cst_8 = arith.constant 1.000000e+00 : f32
    %21 = vector.broadcast %cst_8 : f32 to vector<8x32xf32>
    %22 = arith.addf %21, %20 : vector<8x32xf32>
    %23 = arith.divf %21, %22 : vector<8x32xf32>
    %24 = vector.extract_strided_slice %11 {offsets = [0, 64], sizes = [8, 32], strides = [1, 1]} : vector<8x128xf32> to vector<8x32xf32>
    %25 = math.tanh %24 : vector<8x32xf32>
    %26 = vector.extract_strided_slice %11 {offsets = [0, 96], sizes = [8, 32], strides = [1, 1]} : vector<8x128xf32> to vector<8x32xf32>
    %27 = arith.negf %26 : vector<8x32xf32>
    %28 = math.exp %27 : vector<8x32xf32>
    %cst_9 = arith.constant 1.000000e+00 : f32
    %29 = vector.broadcast %cst_9 : f32 to vector<8x32xf32>
    %30 = arith.addf %29, %28 : vector<8x32xf32>
    %31 = arith.divf %29, %30 : vector<8x32xf32>
    %32 = arith.mulf %23, %1 : vector<8x32xf32>
    %33 = arith.mulf %17, %25 : vector<8x32xf32>
    %34 = arith.addf %32, %33 : vector<8x32xf32>
    %35 = math.tanh %34 : vector<8x32xf32>
    %36 = arith.mulf %31, %35 : vector<8x32xf32>
    %37 = arith.truncf %36 : vector<8x32xf32> to vector<8x32xbf16>
    %38 = vector.shape_cast %37 : vector<8x32xbf16> to vector<1x8x32xbf16>
    %39 = arith.index_cast %c0_i32 : i32 to index
    %c0_10 = arith.constant 0 : index
    %c0_11 = arith.constant 0 : index
    %40 = vector.load %arg4[%39, %c0_10, %c0_11] : memref<8x8x32xbf16, #tpu.memory_space<vmem>>, vector<1x8x32xbf16>
    tpu.vector_store %arg4[%39, %c0_10, %c0_11], %38 {strides = array<i32>} : memref<8x8x32xbf16, #tpu.memory_space<vmem>>, vector<1x8x32xbf16>,
    %c1_i32 = arith.constant 1 : i32
    %41 = arith.index_cast %c1_i32 : i32 to index
    %c0_12 = arith.constant 0 : index
    %c0_13 = arith.constant 0 : index
    %42 = vector.load %arg1[%41, %c0_12, %c0_13] : memref<8x8x32xbf16, #tpu.memory_space<vmem>>, vector<1x8x32xbf16>
    %43 = vector.shape_cast %42 : vector<1x8x32xbf16> to vector<8x32xbf16>
    %44 = arith.truncf %36 : vector<8x32xf32> to vector<8x32xbf16>
    %45 = tpu.concatenate %43, %44 in 1 : vector<8x32xbf16>, vector<8x32xbf16> -> vector<8x64xbf16>
    %c0_14 = arith.constant 0 : index
    %c0_15 = arith.constant 0 : index
    %46 = vector.load %arg2[%c0_14, %c0_15] : memref<64x128xbf16, #tpu.memory_space<vmem>>, vector<64x128xbf16>
    %cst_16 = arith.constant dense<0.000000e+00> : vector<8x128xf32>
    %47 = tpu.matmul %45, %46, %cst_16 {dimension_numbers = #tpu.dot_dimension_numbers<[1], [0], [0], [1], [0, 0, 1, 1], [], []>} : vector<8x64xbf16>, vector<64x128xbf16>, vector<8x128xf32> -> vector<8x128xf32>
    %c0_17 = arith.constant 0 : index
    %c0_18 = arith.constant 0 : index
    %48 = vector.load %arg3[%c0_17, %c0_18] : memref<1x128xf32, #tpu.memory_space<vmem>>, vector<1x128xf32>
    %49 = vector.broadcast %48 : vector<1x128xf32> to vector<8x128xf32>
    %50 = arith.addf %47, %49 : vector<8x128xf32>
    %51 = vector.extract_strided_slice %50 {offsets = [0, 0], sizes = [8, 32], strides = [1, 1]} : vector<8x128xf32> to vector<8x32xf32>
    %52 = arith.negf %51 : vector<8x32xf32>
    %53 = math.exp %52 : vector<8x32xf32>
    %cst_19 = arith.constant 1.000000e+00 : f32
    %54 = vector.broadcast %cst_19 : f32 to vector<8x32xf32>
    %55 = arith.addf %54, %53 : vector<8x32xf32>
    %56 = arith.divf %54, %55 : vector<8x32xf32>
    %57 = vector.extract_strided_slice %50 {offsets = [0, 32], sizes = [8, 32], strides = [1, 1]} : vector<8x128xf32> to vector<8x32xf32>
    %58 = arith.negf %57 : vector<8x32xf32>
    %59 = math.exp %58 : vector<8x32xf32>
    %cst_20 = arith.constant 1.000000e+00 : f32
    %60 = vector.broadcast %cst_20 : f32 to vector<8x32xf32>
    %61 = arith.addf %60, %59 : vector<8x32xf32>
    %62 = arith.divf %60, %61 : vector<8x32xf32>
    %63 = vector.extract_strided_slice %50 {offsets = [0, 64], sizes = [8, 32], strides = [1, 1]} : vector<8x128xf32> to vector<8x32xf32>
    %64 = math.tanh %63 : vector<8x32xf32>
    %65 = vector.extract_strided_slice %50 {offsets = [0, 96], sizes = [8, 32], strides = [1, 1]} : vector<8x128xf32> to vector<8x32xf32>
    %66 = arith.negf %65 : vector<8x32xf32>
    %67 = math.exp %66 : vector<8x32xf32>
    %cst_21 = arith.constant 1.000000e+00 : f32
    %68 = vector.broadcast %cst_21 : f32 to vector<8x32xf32>
    %69 = arith.addf %68, %67 : vector<8x32xf32>
    %70 = arith.divf %68, %69 : vector<8x32xf32>
    %71 = arith.mulf %62, %34 : vector<8x32xf32>
    %72 = arith.mulf %56, %64 : vector<8x32xf32>
    %73 = arith.addf %71, %72 : vector<8x32xf32>
    %74 = math.tanh %73 : vector<8x32xf32>
    %75 = arith.mulf %70, %74 : vector<8x32xf32>
    %76 = arith.truncf %75 : vector<8x32xf32> to vector<8x32xbf16>
    %77 = vector.shape_cast %76 : vector<8x32xbf16> to vector<1x8x32xbf16>
    %78 = arith.index_cast %c1_i32 : i32 to index
    %c0_22 = arith.constant 0 : index
    %c0_23 = arith.constant 0 : index
    %79 = vector.load %arg4[%78, %c0_22, %c0_23] : memref<8x8x32xbf16, #tpu.memory_space<vmem>>, vector<1x8x32xbf16>
    tpu.vector_store %arg4[%78, %c0_22, %c0_23], %77 {strides = array<i32>} : memref<8x8x32xbf16, #tpu.memory_space<vmem>>, vector<1x8x32xbf16>,
    %c2_i32 = arith.constant 2 : i32
    %80 = arith.index_cast %c2_i32 : i32 to index
    %c0_24 = arith.constant 0 : index
    %c0_25 = arith.constant 0 : index
    %81 = vector.load %arg1[%80, %c0_24, %c0_25] : memref<8x8x32xbf16, #tpu.memory_space<vmem>>, vector<1x8x32xbf16>
    %82 = vector.shape_cast %81 : vector<1x8x32xbf16> to vector<8x32xbf16>
    %83 = arith.truncf %75 : vector<8x32xf32> to vector<8x32xbf16>
    %84 = tpu.concatenate %82, %83 in 1 : vector<8x32xbf16>, vector<8x32xbf16> -> vector<8x64xbf16>
    %c0_26 = arith.constant 0 : index
    %c0_27 = arith.constant 0 : index
    %85 = vector.load %arg2[%c0_26, %c0_27] : memref<64x128xbf16, #tpu.memory_space<vmem>>, vector<64x128xbf16>
    %cst_28 = arith.constant dense<0.000000e+00> : vector<8x128xf32>
    %86 = tpu.matmul %84, %85, %cst_28 {dimension_numbers = #tpu.dot_dimension_numbers<[1], [0], [0], [1], [0, 0, 1, 1], [], []>} : vector<8x64xbf16>, vector<64x128xbf16>, vector<8x128xf32> -> vector<8x128xf32>
    %c0_29 = arith.constant 0 : index
    %c0_30 = arith.constant 0 : index
    %87 = vector.load %arg3[%c0_29, %c0_30] : memref<1x128xf32, #tpu.memory_space<vmem>>, vector<1x128xf32>
    %88 = vector.broadcast %87 : vector<1x128xf32> to vector<8x128xf32>
    %89 = arith.addf %86, %88 : vector<8x128xf32>
    %90 = vector.extract_strided_slice %89 {offsets = [0, 0], sizes = [8, 32], strides = [1, 1]} : vector<8x128xf32> to vector<8x32xf32>
    %91 = arith.negf %90 : vector<8x32xf32>
    %92 = math.exp %91 : vector<8x32xf32>
    %cst_31 = arith.constant 1.000000e+00 : f32
    %93 = vector.broadcast %cst_31 : f32 to vector<8x32xf32>
    %94 = arith.addf %93, %92 : vector<8x32xf32>
    %95 = arith.divf %93, %94 : vector<8x32xf32>
    %96 = vector.extract_strided_slice %89 {offsets = [0, 32], sizes = [8, 32], strides = [1, 1]} : vector<8x128xf32> to vector<8x32xf32>
    %97 = arith.negf %96 : vector<8x32xf32>
    %98 = math.exp %97 : vector<8x32xf32>
    %cst_32 = arith.constant 1.000000e+00 : f32
    %99 = vector.broadcast %cst_32 : f32 to vector<8x32xf32>
    %100 = arith.addf %99, %98 : vector<8x32xf32>
    %101 = arith.divf %99, %100 : vector<8x32xf32>
    %102 = vector.extract_strided_slice %89 {offsets = [0, 64], sizes = [8, 32], strides = [1, 1]} : vector<8x128xf32> to vector<8x32xf32>
    %103 = math.tanh %102 : vector<8x32xf32>
    %104 = vector.extract_strided_slice %89 {offsets = [0, 96], sizes = [8, 32], strides = [1, 1]} : vector<8x128xf32> to vector<8x32xf32>
    %105 = arith.negf %104 : vector<8x32xf32>
    %106 = math.exp %105 : vector<8x32xf32>
    %cst_33 = arith.constant 1.000000e+00 : f32
    %107 = vector.broadcast %cst_33 : f32 to vector<8x32xf32>
    %108 = arith.addf %107, %106 : vector<8x32xf32>
    %109 = arith.divf %107, %108 : vector<8x32xf32>
    %110 = arith.mulf %101, %73 : vector<8x32xf32>
    %111 = arith.mulf %95, %103 : vector<8x32xf32>
    %112 = arith.addf %110, %111 : vector<8x32xf32>
    %113 = math.tanh %112 : vector<8x32xf32>
    %114 = arith.mulf %109, %113 : vector<8x32xf32>
    %115 = arith.truncf %114 : vector<8x32xf32> to vector<8x32xbf16>
    %116 = vector.shape_cast %115 : vector<8x32xbf16> to vector<1x8x32xbf16>
    %117 = arith.index_cast %c2_i32 : i32 to index
    %c0_34 = arith.constant 0 : index
    %c0_35 = arith.constant 0 : index
    %118 = vector.load %arg4[%117, %c0_34, %c0_35] : memref<8x8x32xbf16, #tpu.memory_space<vmem>>, vector<1x8x32xbf16>
    tpu.vector_store %arg4[%117, %c0_34, %c0_35], %116 {strides = array<i32>} : memref<8x8x32xbf16, #tpu.memory_space<vmem>>, vector<1x8x32xbf16>,
    %c3_i32 = arith.constant 3 : i32
    %119 = arith.index_cast %c3_i32 : i32 to index
    %c0_36 = arith.constant 0 : index
    %c0_37 = arith.constant 0 : index
    %120 = vector.load %arg1[%119, %c0_36, %c0_37] : memref<8x8x32xbf16, #tpu.memory_space<vmem>>, vector<1x8x32xbf16>
    %121 = vector.shape_cast %120 : vector<1x8x32xbf16> to vector<8x32xbf16>
    %122 = arith.truncf %114 : vector<8x32xf32> to vector<8x32xbf16>
    %123 = tpu.concatenate %121, %122 in 1 : vector<8x32xbf16>, vector<8x32xbf16> -> vector<8x64xbf16>
    %c0_38 = arith.constant 0 : index
    %c0_39 = arith.constant 0 : index
    %124 = vector.load %arg2[%c0_38, %c0_39] : memref<64x128xbf16, #tpu.memory_space<vmem>>, vector<64x128xbf16>
    %cst_40 = arith.constant dense<0.000000e+00> : vector<8x128xf32>
    %125 = tpu.matmul %123, %124, %cst_40 {dimension_numbers = #tpu.dot_dimension_numbers<[1], [0], [0], [1], [0, 0, 1, 1], [], []>} : vector<8x64xbf16>, vector<64x128xbf16>, vector<8x128xf32> -> vector<8x128xf32>
    %c0_41 = arith.constant 0 : index
    %c0_42 = arith.constant 0 : index
    %126 = vector.load %arg3[%c0_41, %c0_42] : memref<1x128xf32, #tpu.memory_space<vmem>>, vector<1x128xf32>
    %127 = vector.broadcast %126 : vector<1x128xf32> to vector<8x128xf32>
    %128 = arith.addf %125, %127 : vector<8x128xf32>
    %129 = vector.extract_strided_slice %128 {offsets = [0, 0], sizes = [8, 32], strides = [1, 1]} : vector<8x128xf32> to vector<8x32xf32>
    %130 = arith.negf %129 : vector<8x32xf32>
    %131 = math.exp %130 : vector<8x32xf32>
    %cst_43 = arith.constant 1.000000e+00 : f32
    %132 = vector.broadcast %cst_43 : f32 to vector<8x32xf32>
    %133 = arith.addf %132, %131 : vector<8x32xf32>
    %134 = arith.divf %132, %133 : vector<8x32xf32>
    %135 = vector.extract_strided_slice %128 {offsets = [0, 32], sizes = [8, 32], strides = [1, 1]} : vector<8x128xf32> to vector<8x32xf32>
    %136 = arith.negf %135 : vector<8x32xf32>
    %137 = math.exp %136 : vector<8x32xf32>
    %cst_44 = arith.constant 1.000000e+00 : f32
    %138 = vector.broadcast %cst_44 : f32 to vector<8x32xf32>
    %139 = arith.addf %138, %137 : vector<8x32xf32>
    %140 = arith.divf %138, %139 : vector<8x32xf32>
    %141 = vector.extract_strided_slice %128 {offsets = [0, 64], sizes = [8, 32], strides = [1, 1]} : vector<8x128xf32> to vector<8x32xf32>
    %142 = math.tanh %141 : vector<8x32xf32>
    %143 = vector.extract_strided_slice %128 {offsets = [0, 96], sizes = [8, 32], strides = [1, 1]} : vector<8x128xf32> to vector<8x32xf32>
    %144 = arith.negf %143 : vector<8x32xf32>
    %145 = math.exp %144 : vector<8x32xf32>
    %cst_45 = arith.constant 1.000000e+00 : f32
    %146 = vector.broadcast %cst_45 : f32 to vector<8x32xf32>
    %147 = arith.addf %146, %145 : vector<8x32xf32>
    %148 = arith.divf %146, %147 : vector<8x32xf32>
    %149 = arith.mulf %140, %112 : vector<8x32xf32>
    %150 = arith.mulf %134, %142 : vector<8x32xf32>
    %151 = arith.addf %149, %150 : vector<8x32xf32>
    %152 = math.tanh %151 : vector<8x32xf32>
    %153 = arith.mulf %148, %152 : vector<8x32xf32>
    %154 = arith.truncf %153 : vector<8x32xf32> to vector<8x32xbf16>
    %155 = vector.shape_cast %154 : vector<8x32xbf16> to vector<1x8x32xbf16>
    %156 = arith.index_cast %c3_i32 : i32 to index
    %c0_46 = arith.constant 0 : index
    %c0_47 = arith.constant 0 : index
    %157 = vector.load %arg4[%156, %c0_46, %c0_47] : memref<8x8x32xbf16, #tpu.memory_space<vmem>>, vector<1x8x32xbf16>
    tpu.vector_store %arg4[%156, %c0_46, %c0_47], %155 {strides = array<i32>} : memref<8x8x32xbf16, #tpu.memory_space<vmem>>, vector<1x8x32xbf16>,
    %c4_i32 = arith.constant 4 : i32
    %158 = arith.index_cast %c4_i32 : i32 to index
    %c0_48 = arith.constant 0 : index
    %c0_49 = arith.constant 0 : index
    %159 = vector.load %arg1[%158, %c0_48, %c0_49] : memref<8x8x32xbf16, #tpu.memory_space<vmem>>, vector<1x8x32xbf16>
    %160 = vector.shape_cast %159 : vector<1x8x32xbf16> to vector<8x32xbf16>
    %161 = arith.truncf %153 : vector<8x32xf32> to vector<8x32xbf16>
    %162 = tpu.concatenate %160, %161 in 1 : vector<8x32xbf16>, vector<8x32xbf16> -> vector<8x64xbf16>
    %c0_50 = arith.constant 0 : index
    %c0_51 = arith.constant 0 : index
    %163 = vector.load %arg2[%c0_50, %c0_51] : memref<64x128xbf16, #tpu.memory_space<vmem>>, vector<64x128xbf16>
    %cst_52 = arith.constant dense<0.000000e+00> : vector<8x128xf32>
    %164 = tpu.matmul %162, %163, %cst_52 {dimension_numbers = #tpu.dot_dimension_numbers<[1], [0], [0], [1], [0, 0, 1, 1], [], []>} : vector<8x64xbf16>, vector<64x128xbf16>, vector<8x128xf32> -> vector<8x128xf32>
    %c0_53 = arith.constant 0 : index
    %c0_54 = arith.constant 0 : index
    %165 = vector.load %arg3[%c0_53, %c0_54] : memref<1x128xf32, #tpu.memory_space<vmem>>, vector<1x128xf32>
    %166 = vector.broadcast %165 : vector<1x128xf32> to vector<8x128xf32>
    %167 = arith.addf %164, %166 : vector<8x128xf32>
    %168 = vector.extract_strided_slice %167 {offsets = [0, 0], sizes = [8, 32], strides = [1, 1]} : vector<8x128xf32> to vector<8x32xf32>
    %169 = arith.negf %168 : vector<8x32xf32>
    %170 = math.exp %169 : vector<8x32xf32>
    %cst_55 = arith.constant 1.000000e+00 : f32
    %171 = vector.broadcast %cst_55 : f32 to vector<8x32xf32>
    %172 = arith.addf %171, %170 : vector<8x32xf32>
    %173 = arith.divf %171, %172 : vector<8x32xf32>
    %174 = vector.extract_strided_slice %167 {offsets = [0, 32], sizes = [8, 32], strides = [1, 1]} : vector<8x128xf32> to vector<8x32xf32>
    %175 = arith.negf %174 : vector<8x32xf32>
    %176 = math.exp %175 : vector<8x32xf32>
    %cst_56 = arith.constant 1.000000e+00 : f32
    %177 = vector.broadcast %cst_56 : f32 to vector<8x32xf32>
    %178 = arith.addf %177, %176 : vector<8x32xf32>
    %179 = arith.divf %177, %178 : vector<8x32xf32>
    %180 = vector.extract_strided_slice %167 {offsets = [0, 64], sizes = [8, 32], strides = [1, 1]} : vector<8x128xf32> to vector<8x32xf32>
    %181 = math.tanh %180 : vector<8x32xf32>
    %182 = vector.extract_strided_slice %167 {offsets = [0, 96], sizes = [8, 32], strides = [1, 1]} : vector<8x128xf32> to vector<8x32xf32>
    %183 = arith.negf %182 : vector<8x32xf32>
    %184 = math.exp %183 : vector<8x32xf32>
    %cst_57 = arith.constant 1.000000e+00 : f32
    %185 = vector.broadcast %cst_57 : f32 to vector<8x32xf32>
    %186 = arith.addf %185, %184 : vector<8x32xf32>
    %187 = arith.divf %185, %186 : vector<8x32xf32>
    %188 = arith.mulf %179, %151 : vector<8x32xf32>
    %189 = arith.mulf %173, %181 : vector<8x32xf32>
    %190 = arith.addf %188, %189 : vector<8x32xf32>
    %191 = math.tanh %190 : vector<8x32xf32>
    %192 = arith.mulf %187, %191 : vector<8x32xf32>
    %193 = arith.truncf %192 : vector<8x32xf32> to vector<8x32xbf16>
    %194 = vector.shape_cast %193 : vector<8x32xbf16> to vector<1x8x32xbf16>
    %195 = arith.index_cast %c4_i32 : i32 to index
    %c0_58 = arith.constant 0 : index
    %c0_59 = arith.constant 0 : index
    %196 = vector.load %arg4[%195, %c0_58, %c0_59] : memref<8x8x32xbf16, #tpu.memory_space<vmem>>, vector<1x8x32xbf16>
    tpu.vector_store %arg4[%195, %c0_58, %c0_59], %194 {strides = array<i32>} : memref<8x8x32xbf16, #tpu.memory_space<vmem>>, vector<1x8x32xbf16>,
    %c5_i32 = arith.constant 5 : i32
    %197 = arith.index_cast %c5_i32 : i32 to index
    %c0_60 = arith.constant 0 : index
    %c0_61 = arith.constant 0 : index
    %198 = vector.load %arg1[%197, %c0_60, %c0_61] : memref<8x8x32xbf16, #tpu.memory_space<vmem>>, vector<1x8x32xbf16>
    %199 = vector.shape_cast %198 : vector<1x8x32xbf16> to vector<8x32xbf16>
    %200 = arith.truncf %192 : vector<8x32xf32> to vector<8x32xbf16>
    %201 = tpu.concatenate %199, %200 in 1 : vector<8x32xbf16>, vector<8x32xbf16> -> vector<8x64xbf16>
    %c0_62 = arith.constant 0 : index
    %c0_63 = arith.constant 0 : index
    %202 = vector.load %arg2[%c0_62, %c0_63] : memref<64x128xbf16, #tpu.memory_space<vmem>>, vector<64x128xbf16>
    %cst_64 = arith.constant dense<0.000000e+00> : vector<8x128xf32>
    %203 = tpu.matmul %201, %202, %cst_64 {dimension_numbers = #tpu.dot_dimension_numbers<[1], [0], [0], [1], [0, 0, 1, 1], [], []>} : vector<8x64xbf16>, vector<64x128xbf16>, vector<8x128xf32> -> vector<8x128xf32>
    %c0_65 = arith.constant 0 : index
    %c0_66 = arith.constant 0 : index
    %204 = vector.load %arg3[%c0_65, %c0_66] : memref<1x128xf32, #tpu.memory_space<vmem>>, vector<1x128xf32>
    %205 = vector.broadcast %204 : vector<1x128xf32> to vector<8x128xf32>
    %206 = arith.addf %203, %205 : vector<8x128xf32>
    %207 = vector.extract_strided_slice %206 {offsets = [0, 0], sizes = [8, 32], strides = [1, 1]} : vector<8x128xf32> to vector<8x32xf32>
    %208 = arith.negf %207 : vector<8x32xf32>
    %209 = math.exp %208 : vector<8x32xf32>
    %cst_67 = arith.constant 1.000000e+00 : f32
    %210 = vector.broadcast %cst_67 : f32 to vector<8x32xf32>
    %211 = arith.addf %210, %209 : vector<8x32xf32>
    %212 = arith.divf %210, %211 : vector<8x32xf32>
    %213 = vector.extract_strided_slice %206 {offsets = [0, 32], sizes = [8, 32], strides = [1, 1]} : vector<8x128xf32> to vector<8x32xf32>
    %214 = arith.negf %213 : vector<8x32xf32>
    %215 = math.exp %214 : vector<8x32xf32>
    %cst_68 = arith.constant 1.000000e+00 : f32
    %216 = vector.broadcast %cst_68 : f32 to vector<8x32xf32>
    %217 = arith.addf %216, %215 : vector<8x32xf32>
    %218 = arith.divf %216, %217 : vector<8x32xf32>
    %219 = vector.extract_strided_slice %206 {offsets = [0, 64], sizes = [8, 32], strides = [1, 1]} : vector<8x128xf32> to vector<8x32xf32>
    %220 = math.tanh %219 : vector<8x32xf32>
    %221 = vector.extract_strided_slice %206 {offsets = [0, 96], sizes = [8, 32], strides = [1, 1]} : vector<8x128xf32> to vector<8x32xf32>
    %222 = arith.negf %221 : vector<8x32xf32>
    %223 = math.exp %222 : vector<8x32xf32>
    %cst_69 = arith.constant 1.000000e+00 : f32
    %224 = vector.broadcast %cst_69 : f32 to vector<8x32xf32>
    %225 = arith.addf %224, %223 : vector<8x32xf32>
    %226 = arith.divf %224, %225 : vector<8x32xf32>
    %227 = arith.mulf %218, %190 : vector<8x32xf32>
    %228 = arith.mulf %212, %220 : vector<8x32xf32>
    %229 = arith.addf %227, %228 : vector<8x32xf32>
    %230 = math.tanh %229 : vector<8x32xf32>
    %231 = arith.mulf %226, %230 : vector<8x32xf32>
    %232 = arith.truncf %231 : vector<8x32xf32> to vector<8x32xbf16>
    %233 = vector.shape_cast %232 : vector<8x32xbf16> to vector<1x8x32xbf16>
    %234 = arith.index_cast %c5_i32 : i32 to index
    %c0_70 = arith.constant 0 : index
    %c0_71 = arith.constant 0 : index
    %235 = vector.load %arg4[%234, %c0_70, %c0_71] : memref<8x8x32xbf16, #tpu.memory_space<vmem>>, vector<1x8x32xbf16>
    tpu.vector_store %arg4[%234, %c0_70, %c0_71], %233 {strides = array<i32>} : memref<8x8x32xbf16, #tpu.memory_space<vmem>>, vector<1x8x32xbf16>,
    %c6_i32 = arith.constant 6 : i32
    %236 = arith.index_cast %c6_i32 : i32 to index
    %c0_72 = arith.constant 0 : index
    %c0_73 = arith.constant 0 : index
    %237 = vector.load %arg1[%236, %c0_72, %c0_73] : memref<8x8x32xbf16, #tpu.memory_space<vmem>>, vector<1x8x32xbf16>
    %238 = vector.shape_cast %237 : vector<1x8x32xbf16> to vector<8x32xbf16>
    %239 = arith.truncf %231 : vector<8x32xf32> to vector<8x32xbf16>
    %240 = tpu.concatenate %238, %239 in 1 : vector<8x32xbf16>, vector<8x32xbf16> -> vector<8x64xbf16>
    %c0_74 = arith.constant 0 : index
    %c0_75 = arith.constant 0 : index
    %241 = vector.load %arg2[%c0_74, %c0_75] : memref<64x128xbf16, #tpu.memory_space<vmem>>, vector<64x128xbf16>
    %cst_76 = arith.constant dense<0.000000e+00> : vector<8x128xf32>
    %242 = tpu.matmul %240, %241, %cst_76 {dimension_numbers = #tpu.dot_dimension_numbers<[1], [0], [0], [1], [0, 0, 1, 1], [], []>} : vector<8x64xbf16>, vector<64x128xbf16>, vector<8x128xf32> -> vector<8x128xf32>
    %c0_77 = arith.constant 0 : index
    %c0_78 = arith.constant 0 : index
    %243 = vector.load %arg3[%c0_77, %c0_78] : memref<1x128xf32, #tpu.memory_space<vmem>>, vector<1x128xf32>
    %244 = vector.broadcast %243 : vector<1x128xf32> to vector<8x128xf32>
    %245 = arith.addf %242, %244 : vector<8x128xf32>
    %246 = vector.extract_strided_slice %245 {offsets = [0, 0], sizes = [8, 32], strides = [1, 1]} : vector<8x128xf32> to vector<8x32xf32>
    %247 = arith.negf %246 : vector<8x32xf32>
    %248 = math.exp %247 : vector<8x32xf32>
    %cst_79 = arith.constant 1.000000e+00 : f32
    %249 = vector.broadcast %cst_79 : f32 to vector<8x32xf32>
    %250 = arith.addf %249, %248 : vector<8x32xf32>
    %251 = arith.divf %249, %250 : vector<8x32xf32>
    %252 = vector.extract_strided_slice %245 {offsets = [0, 32], sizes = [8, 32], strides = [1, 1]} : vector<8x128xf32> to vector<8x32xf32>
    %253 = arith.negf %252 : vector<8x32xf32>
    %254 = math.exp %253 : vector<8x32xf32>
    %cst_80 = arith.constant 1.000000e+00 : f32
    %255 = vector.broadcast %cst_80 : f32 to vector<8x32xf32>
    %256 = arith.addf %255, %254 : vector<8x32xf32>
    %257 = arith.divf %255, %256 : vector<8x32xf32>
    %258 = vector.extract_strided_slice %245 {offsets = [0, 64], sizes = [8, 32], strides = [1, 1]} : vector<8x128xf32> to vector<8x32xf32>
    %259 = math.tanh %258 : vector<8x32xf32>
    %260 = vector.extract_strided_slice %245 {offsets = [0, 96], sizes = [8, 32], strides = [1, 1]} : vector<8x128xf32> to vector<8x32xf32>
    %261 = arith.negf %260 : vector<8x32xf32>
    %262 = math.exp %261 : vector<8x32xf32>
    %cst_81 = arith.constant 1.000000e+00 : f32
    %263 = vector.broadcast %cst_81 : f32 to vector<8x32xf32>
    %264 = arith.addf %263, %262 : vector<8x32xf32>
    %265 = arith.divf %263, %264 : vector<8x32xf32>
    %266 = arith.mulf %257, %229 : vector<8x32xf32>
    %267 = arith.mulf %251, %259 : vector<8x32xf32>
    %268 = arith.addf %266, %267 : vector<8x32xf32>
    %269 = math.tanh %268 : vector<8x32xf32>
    %270 = arith.mulf %265, %269 : vector<8x32xf32>
    %271 = arith.truncf %270 : vector<8x32xf32> to vector<8x32xbf16>
    %272 = vector.shape_cast %271 : vector<8x32xbf16> to vector<1x8x32xbf16>
    %273 = arith.index_cast %c6_i32 : i32 to index
    %c0_82 = arith.constant 0 : index
    %c0_83 = arith.constant 0 : index
    %274 = vector.load %arg4[%273, %c0_82, %c0_83] : memref<8x8x32xbf16, #tpu.memory_space<vmem>>, vector<1x8x32xbf16>
    tpu.vector_store %arg4[%273, %c0_82, %c0_83], %272 {strides = array<i32>} : memref<8x8x32xbf16, #tpu.memory_space<vmem>>, vector<1x8x32xbf16>,
    %c7_i32 = arith.constant 7 : i32
    %275 = arith.index_cast %c7_i32 : i32 to index
    %c0_84 = arith.constant 0 : index
    %c0_85 = arith.constant 0 : index
    %276 = vector.load %arg1[%275, %c0_84, %c0_85] : memref<8x8x32xbf16, #tpu.memory_space<vmem>>, vector<1x8x32xbf16>
    %277 = vector.shape_cast %276 : vector<1x8x32xbf16> to vector<8x32xbf16>
    %278 = arith.truncf %270 : vector<8x32xf32> to vector<8x32xbf16>
    %279 = tpu.concatenate %277, %278 in 1 : vector<8x32xbf16>, vector<8x32xbf16> -> vector<8x64xbf16>
    %c0_86 = arith.constant 0 : index
    %c0_87 = arith.constant 0 : index
    %280 = vector.load %arg2[%c0_86, %c0_87] : memref<64x128xbf16, #tpu.memory_space<vmem>>, vector<64x128xbf16>
    %cst_88 = arith.constant dense<0.000000e+00> : vector<8x128xf32>
    %281 = tpu.matmul %279, %280, %cst_88 {dimension_numbers = #tpu.dot_dimension_numbers<[1], [0], [0], [1], [0, 0, 1, 1], [], []>} : vector<8x64xbf16>, vector<64x128xbf16>, vector<8x128xf32> -> vector<8x128xf32>
    %c0_89 = arith.constant 0 : index
    %c0_90 = arith.constant 0 : index
    %282 = vector.load %arg3[%c0_89, %c0_90] : memref<1x128xf32, #tpu.memory_space<vmem>>, vector<1x128xf32>
    %283 = vector.broadcast %282 : vector<1x128xf32> to vector<8x128xf32>
    %284 = arith.addf %281, %283 : vector<8x128xf32>
    %285 = vector.extract_strided_slice %284 {offsets = [0, 0], sizes = [8, 32], strides = [1, 1]} : vector<8x128xf32> to vector<8x32xf32>
    %286 = arith.negf %285 : vector<8x32xf32>
    %287 = math.exp %286 : vector<8x32xf32>
    %cst_91 = arith.constant 1.000000e+00 : f32
    %288 = vector.broadcast %cst_91 : f32 to vector<8x32xf32>
    %289 = arith.addf %288, %287 : vector<8x32xf32>
    %290 = arith.divf %288, %289 : vector<8x32xf32>
    %291 = vector.extract_strided_slice %284 {offsets = [0, 32], sizes = [8, 32], strides = [1, 1]} : vector<8x128xf32> to vector<8x32xf32>
    %292 = arith.negf %291 : vector<8x32xf32>
    %293 = math.exp %292 : vector<8x32xf32>
    %cst_92 = arith.constant 1.000000e+00 : f32
    %294 = vector.broadcast %cst_92 : f32 to vector<8x32xf32>
    %295 = arith.addf %294, %293 : vector<8x32xf32>
    %296 = arith.divf %294, %295 : vector<8x32xf32>
    %297 = vector.extract_strided_slice %284 {offsets = [0, 64], sizes = [8, 32], strides = [1, 1]} : vector<8x128xf32> to vector<8x32xf32>
    %298 = math.tanh %297 : vector<8x32xf32>
    %299 = vector.extract_strided_slice %284 {offsets = [0, 96], sizes = [8, 32], strides = [1, 1]} : vector<8x128xf32> to vector<8x32xf32>
    %300 = arith.negf %299 : vector<8x32xf32>
    %301 = math.exp %300 : vector<8x32xf32>
    %cst_93 = arith.constant 1.000000e+00 : f32
    %302 = vector.broadcast %cst_93 : f32 to vector<8x32xf32>
    %303 = arith.addf %302, %301 : vector<8x32xf32>
    %304 = arith.divf %302, %303 : vector<8x32xf32>
    %305 = arith.mulf %296, %268 : vector<8x32xf32>
    %306 = arith.mulf %290, %298 : vector<8x32xf32>
    %307 = arith.addf %305, %306 : vector<8x32xf32>
    %308 = math.tanh %307 : vector<8x32xf32>
    %309 = arith.mulf %304, %308 : vector<8x32xf32>
    %310 = arith.truncf %309 : vector<8x32xf32> to vector<8x32xbf16>
    %311 = vector.shape_cast %310 : vector<8x32xbf16> to vector<1x8x32xbf16>
    %312 = arith.index_cast %c7_i32 : i32 to index
    %c0_94 = arith.constant 0 : index
    %c0_95 = arith.constant 0 : index
    %313 = vector.load %arg4[%312, %c0_94, %c0_95] : memref<8x8x32xbf16, #tpu.memory_space<vmem>>, vector<1x8x32xbf16>
    tpu.vector_store %arg4[%312, %c0_94, %c0_95], %311 {strides = array<i32>} : memref<8x8x32xbf16, #tpu.memory_space<vmem>>, vector<1x8x32xbf16>,
    %c8_i32 = arith.constant 8 : i32
    return
  }
  func.func @transform_0(%arg0: i32) -> (i32, i32, i32) {
    %c0_i32 = arith.constant 0 : i32
    %c0_i32_0 = arith.constant 0 : i32
    %c0_i32_1 = arith.constant 0 : i32
    %c0_i32_2 = arith.constant 0 : i32
    return %c0_i32, %c0_i32_0, %c0_i32_1 : i32, i32, i32
  }
  func.func @transform_1(%arg0: i32) -> (i32, i32) {
    %c0_i32 = arith.constant 0 : i32
    %c0_i32_0 = arith.constant 0 : i32
    %c0_i32_1 = arith.constant 0 : i32
    return %c0_i32, %c0_i32_0 : i32, i32
  }
  func.func @transform_2(%arg0: i32) -> (i32, i32) {
    %c0_i32 = arith.constant 0 : i32
    %c0_i32_0 = arith.constant 0 : i32
    %c0_i32_1 = arith.constant 0 : i32
    return %c0_i32, %c0_i32_0 : i32, i32
  }
  func.func @transform_3(%arg0: i32) -> (i32, i32, i32) {
    %c0_i32 = arith.constant 0 : i32
    %c0_i32_0 = arith.constant 0 : i32
    %c0_i32_1 = arith.constant 0 : i32
    %c0_i32_2 = arith.constant 0 : i32
    return %c0_i32, %c0_i32_0, %c0_i32_1 : i32, i32, i32
  }
}

</mosaic_0001>

<bundles_post_ra>
// kernel: decoder_rnn_forward.3
= control target key start
LH: loop header
LB: loop body
LE: loop exit
PB: predicated region body
PF: predicated region fallthrough
CT: control target
= control target key end

     0   :  { %vm66_vm0 = vcmask 261120   ;;  %s260_s1 = inlined_call_operand.vmem [shape: bf16[32,128], index: 1, kind: input, shape index: {}]   ;;  %s261_s0 = inlined_call_operand.vmem [shape: bf16[64,32], index: 0, kind: input, shape index: {}]   ;;  %s262_s2 = inlined_call_operand.vmem [shape: f32[1,128], index: 2, kind: input, shape index: {}]   ;;  %s263_s3 = inlined_call_operand.vmem [shape: f32[64,128], index: 3, kind: output, shape index: {}]  }
   0x1   :  { %v189_v0 = vld [vmem:[%s260_s1] sm:$0xff]   ;;  %v190_v1 = vld [vmem:[%s260_s1 + $0x8] sm:$0xff]   ;;  %v192_v3 = vld [vmem:[%s261_s0 + $0x10] sm:$0xff]  }
   0x2   :  { %173 = vmatprep.subr.bf16.mxu0 %v189_v0  ;;  %185 = vmatprep.subr.bf16.mxu1 %v189_v0  ;;  %v191_v2 = vld [vmem:[%s261_s0] sm:$0xff]   ;;  %v193_v4 = vld [vmem:[%s261_s0 + $0x8] sm:$0xff]   ;;  %v194_v5 = vld [vmem:[%s261_s0 + $0x18] sm:$0xff]  }
   0x3   :  { %174 = vmatpush3.bf16.msra.mxu0 %v189_v0  ;;  %187 = vmatpush3.bf16.msra.mxu1 %v189_v0  ;;  %v156_v6 = vld [vmem:[%s262_s2] ss:$0 sm:$0xff] }
   0x4   :  { %175 = vmatprep.subr.bf16.mxu0 %v190_v1  ;;  %186 = vmatprep.subr.bf16.mxu1 %v190_v1 }
   0x5   :  { %177 = vmatprep.mubr.msk.bf16.mxu0 %vm66_vm0, %v191_v2  ;;  %181 = vmatprep.mubr.msk.bf16.mxu1 %vm66_vm0, %v192_v3 }
   0x7   :  { %176 = vmatpush3.bf16.msra.mxu0 %v190_v1  ;;  %188 = vmatpush3.bf16.msra.mxu1 %v190_v1 }
   0xa   :  { %178 = vmatmul.mubr.msk.bf16.vlgmr.msra.gmra.mrb[0].mxu0 %vm66_vm0, %v193_v4  ;;  %182 = vmatmul.mubr.msk.bf16.vlgmr.msra.gmra.mrb[0].mxu1 %vm66_vm0, %v194_v5 }
  0xdd   :  { %v179_v7 = vpop.f32.mrb[0].mxu0  ;;  %v183_v8 = vpop.f32.mrb[0].mxu1 }
  0xde   :  { %v122_v9 = vadd.f32 %v179_v7, %v156_v6  ;;  %v138_v10 = vadd.f32 %v183_v8, %v156_v6  ;;  %v113_v11 = vpop.f32.mrb[1].mxu0  ;;  %v129_v12 = vpop.f32.mrb[1].mxu1 }
  0xdf   :  { %v114_v13 = vadd.f32 %v156_v6, %v113_v11  ;;  %v130_v14 = vadd.f32 %v156_v6, %v129_v12  ;;  %v180_v15 = vpop.f32.mrb[2].mxu0  ;;  %v184_v16 = vpop.f32.mrb[2].mxu1 }
  0xe0   :  { %146 = vst [vmem:[%s263_s3 + $0x10] sm:$0xff] %v122_v9  ;;  %150 = vst [vmem:[%s263_s3 + $0x30] sm:$0xff] %v138_v10  ;;  %v125_v17 = vadd.f32 %v180_v15, %v156_v6  ;;  %v141_v18 = vadd.f32 %v184_v16, %v156_v6  ;;  %v116_v19 = vpop.f32.mrb[3].mxu0  ;;  %v132_v20 = vpop.f32.mrb[3].mxu1 }
  0xe1   :  { %144 = vst [vmem:[%s263_s3] sm:$0xff] %v114_v13  ;;  %148 = vst [vmem:[%s263_s3 + $0x20] sm:$0xff] %v130_v14  ;;  %v117_v21 = vadd.f32 %v156_v6, %v116_v19  ;;  %v133_v22 = vadd.f32 %v156_v6, %v132_v20 }
  0xe2   :  { %147 = vst [vmem:[%s263_s3 + $0x18] sm:$0xff] %v125_v17  ;;  %151 = vst [vmem:[%s263_s3 + $0x38] sm:$0xff] %v141_v18 }
  0xe3   :  { %145 = vst [vmem:[%s263_s3 + $0x8] sm:$0xff] %v117_v21  ;;  %149 = vst [vmem:[%s263_s3 + $0x28] sm:$0xff] %v133_v22 }

// kernel: decoder_rnn_forward.2
= control target key start
LH: loop header
LB: loop body
LE: loop exit
PB: predicated region body
PF: predicated region fallthrough
CT: control target
= control target key end

     0   :  { %v1308_v0 = vmov 0.0   ;;  %vm1309_vm0 = vmmov 0   ;;  %vm16_vm1 = vcmask 261120   ;;  %vm59_vm2 = vcmask 523264   ;;  %s1310_s24 = smov 64   ;;  %s1624_s1 = inlined_call_operand.vmem [shape: bf16[64,128], index: 1, kind: input, shape index: {}]   ;;  %s1625_s0 = inlined_call_operand.vmem [shape: bf16[8,8,32], index: 0, kind: input, shape index: {}]   ;;  %s1626_s2 = inlined_call_operand.vmem [shape: f32[1,128], index: 2, kind: input, shape index: {}]   ;;  %s1627_s3 = inlined_call_operand.vmem [shape: bf16[8,8,32], index: 3, kind: output, shape index: {}]  }
   0x1   :  { %1112 = vmatprep.subr.bf16.mxu0 %v1308_v0  ;;  %v1212_v1 = vld [vmem:[%s1624_s1] sm:$0xff]   ;;  %1120 = vmatprep.mubr.msk.bf16.mxu0 %vm1309_vm0, %v1308_v0  ;;  %v1213_v2 = vld [vmem:[%s1624_s1 + $0x8] sm:$0xff]   ;;  %v1214_v4 = vld [vmem:[%s1624_s1 + $0x10] sm:$0xff]   ;;  %vm133_vm3 = vcmask 257024  }
   0x2   :  { %1124 = vmatprep.subr.bf16.mxu1 %v1308_v0  ;;  %1132 = vmatprep.mubr.msk.bf16.mxu1 %vm1309_vm0, %v1308_v0  ;;  %v15_v3 = vld [vmem:[%s1625_s0] sm:$0xf]  ;;  %v1215_v6 = vld [vmem:[%s1624_s1 + $0x18] sm:$0xff]   ;;  %v1217_v24 = vld [vmem:[%s1624_s1 + $0x8] sm:$0xff]  }
   0x3   :  { %1113 = vmatpush3.bf16.msra.mxu0 %v1212_v1  ;;  %v19_v5 = vsel %vm16_vm1, %v15_v3, 0  ;;  %v1364_v7 = vld [vmem:[%s1626_s2] ss:$0 sm:$0xff]  ;;  %s1311_s2 = smov 32   ;;  %v1218_v25 = vld [vmem:[%s1624_s1 + $0x10] sm:$0xff]   ;;  %v1219_v27 = vld [vmem:[%s1624_s1 + $0x18] sm:$0xff]  }
   0x4   :  { %1114 = vmatprep.subr.bf16.mxu0 %v1308_v0  ;;  %v1216_v23 = vld [vmem:[%s1624_s1] sm:$0xff]   ;;  %v1221_v50 = vld [vmem:[%s1624_s1 + $0x8] sm:$0xff]   ;;  %v1222_v51 = vld [vmem:[%s1624_s1 + $0x10] sm:$0xff]  }
   0x5   :  { %1125 = vmatpush3.bf16.msra.mxu1 %v1216_v23  ;;  %v994_v31 = vld [vmem:[%s1625_s0 + $0x4] sm:$0xf]  ;;  %v1223_v53 = vld [vmem:[%s1624_s1 + $0x18] sm:$0xff]   ;;  %v1004_v57 = vld [vmem:[%s1625_s0 + $0x8] sm:$0xf] }
   0x6   :  { %1126 = vmatprep.subr.bf16.mxu1 %v1308_v0  ;;  %v1220_v49 = vld [vmem:[%s1624_s1] sm:$0xff]  }
   0x7   :  { %1115 = vmatpush3.bf16.msra.mxu0 %v1213_v2 }
   0x8   :  { %1116 = vmatprep.subr.bf16.mxu0 %v1308_v0 }
   0x9   :  { %1127 = vmatpush3.bf16.msra.mxu1 %v1217_v24 }
   0xa   :  { %1128 = vmatprep.subr.bf16.mxu1 %v1308_v0 }
   0xb   :  { %1117 = vmatpush3.bf16.msra.mxu0 %v1214_v4 }
   0xc   :  { %1118 = vmatprep.subr.bf16.mxu0 %v1308_v0 }
   0xd   :  { %1129 = vmatpush3.bf16.msra.mxu1 %v1218_v25 }
   0xe   :  { %1130 = vmatprep.subr.bf16.mxu1 %v1308_v0 }
   0xf   :  { %1119 = vmatpush3.bf16.msra.mxu0 %v1215_v6 }
  0x10   :  { %1136 = vmatprep.subr.bf16.mxu0 %v1308_v0 }
  0x11   :  { %1131 = vmatpush3.bf16.msra.mxu1 %v1219_v27 }
  0x12   :  { %1121 = vmatmul.mubr.msk.bf16.vlgmr.msra.gmra.mrb[0].mxu0 %vm59_vm2, %v19_v5  ;;  %1148 = vmatprep.subr.bf16.mxu1 %v1308_v0 }
  0x13   :  { %1144 = vmatprep.mubr.msk.bf16.mxu0 %vm1309_vm0, %v1308_v0  ;;  %1137 = vmatpush3.bf16.msra.mxu0 %v1220_v49 }
  0x14   :  { %1138 = vmatprep.subr.bf16.mxu0 %v1308_v0 }
  0x17   :  { %1139 = vmatpush3.bf16.msra.mxu0 %v1221_v50 }
  0x18   :  { %1140 = vmatprep.subr.bf16.mxu0 %v1308_v0 }
  0x1b   :  { %1141 = vmatpush3.bf16.msra.mxu0 %v1222_v51 }
  0x1c   :  { %1142 = vmatprep.subr.bf16.mxu0 %v1308_v0 }
  0x1f   :  { %1143 = vmatpush3.bf16.msra.mxu0 %v1223_v53 }
  0x20   :  { %1160 = vmatprep.subr.bf16.mxu0 %v1308_v0 }
  0xe5   :  { %v96_v8 = vpop.f32.mrb[0].mxu0 }
  0xe6   :  { %v97_v9 = vadd.f32 %v1364_v7, %v96_v8  ;;  %v1122_v10 = vpop.f32.mrb[1].mxu0 }
  0xe7   :  { %v99_v11 = vpop.f32.mrb[2].mxu0 }
  0xe8   :  { %1244 = vtanh.f32 %v97_v9  ;;  %v1123_v12 = vpop.f32.mrb[3].mxu0  ;;  %v992_v14 = vmul.f32 -1.442695, %v97_v9 }
  0xea   :  { %1246 = vpow2.f32 %v992_v14  ;;  %v1225_v14 = vld [vmem:[%s1624_s1 + $0x8] sm:$0xff]  }
  0xf2   :  { %v1245_v13 = vpop.eup %1244 }
  0xf3   :  { %111 = vrot.lane.b32.xlu0 %v1245_v13, %s1310_s24  ;;  %v1224_v13 = vld [vmem:[%s1624_s1] sm:$0xff]  }
  0xf4   :  { %v1247_v15 = vpop.eup %1246 }
  0xf5   :  { %v105_v16 = vadd.f32 1.0, %v1247_v15  ;;  %v1226_v15 = vld [vmem:[%s1624_s1 + $0x10] sm:$0xff]  }
  0xf7   :  { %1248 = vrcp.f32 %v105_v16 }
 0x101   :  { %v1249_v17 = vpop.eup %1248 }
 0x102   :  { %v109_v20 = vmul.f32 0.0, %v1249_v17 }
 0x165   :  { %v112_v18 = vpop.permute.xlu0 %111 }
 0x166   :  { %v114_v19 = vmul.f32 %v1249_v17, %v112_v18 }
 0x168   :  { %116 = vrot.lane.b32.xlu0 %v114_v19, %s1311_s2 }
 0x1da   :  { %v117_v21 = vpop.permute.xlu0 %116 }
 0x1db   :  { %v119_v22 = vadd.f32 %v117_v21, %v109_v20  ;;  %v1014_v21 = vld [vmem:[%s1625_s0 + $0xc] sm:$0xf] }
 0x1dd   :  { %1250 = vtanh.f32 %v119_v22 }
 0x1e7   :  { %v1251_v26 = vpop.eup %1250 }
 0x1e8   :  { %122 = vrot.lane.b32.xlu1 %v1251_v26, %s1310_s24 }
 0x25a   :  { %v123_v28 = vpop.permute.xlu1 %122 }
 0x25b   :  { %v125_v29 = vmul.f32 %v1249_v17, %v123_v28  ;;  %v1227_v17 = vld [vmem:[%s1624_s1 + $0x18] sm:$0xff]  }
 0x25d   :  { %v1386_v30 = vpack.c.bf16 %v125_v29, %v125_v29 }
 0x25f   :  { %137 = vrot.lane.b32.xlu1 %v1386_v30, %s1310_s24 }
 0x2d1   :  { %v138_v32 = vpop.permute.xlu1 %137 }
 0x2d2   :  { %v141_v33 = vsel %vm16_vm1, %v994_v31, %v138_v32 }
 0x2d3   :  { %1133 = vmatmul.mubr.msk.bf16.vlgmr.msra.gmra.mrb[0].mxu1 %vm59_vm2, %v141_v33 }
 0x2d4   :  { %1156 = vmatprep.mubr.msk.bf16.mxu1 %vm1309_vm0, %v1308_v0  ;;  %1149 = vmatpush3.bf16.msra.mxu1 %v1224_v13  ;;  %v1034_v13 = vld [vmem:[%s1625_s0 + $0x14] sm:$0xf] }
 0x2d5   :  { %1150 = vmatprep.subr.bf16.mxu1 %v1308_v0 }
 0x2d8   :  { %1151 = vmatpush3.bf16.msra.mxu1 %v1225_v14 }
 0x2d9   :  { %1152 = vmatprep.subr.bf16.mxu1 %v1308_v0 }
 0x2dc   :  { %1153 = vmatpush3.bf16.msra.mxu1 %v1226_v15 }
 0x2dd   :  { %1154 = vmatprep.subr.bf16.mxu1 %v1308_v0 }
 0x2e0   :  { %1155 = vmatpush3.bf16.msra.mxu1 %v1227_v17 }
 0x2e1   :  { %1172 = vmatprep.subr.bf16.mxu1 %v1308_v0 }
 0x3a6   :  { %v217_v34 = vpop.f32.mrb[0].mxu1 }
 0x3a7   :  { %v218_v35 = vadd.f32 %v1364_v7, %v217_v34  ;;  %v1134_v36 = vpop.f32.mrb[1].mxu1 }
 0x3a8   :  { %v220_v37 = vpop.f32.mrb[2].mxu1 }
 0x3a9   :  { %1252 = vtanh.f32 %v218_v35  ;;  %v1135_v38 = vpop.f32.mrb[3].mxu1  ;;  %v1001_v40 = vmul.f32 -1.442695, %v218_v35 }
 0x3ab   :  { %1254 = vpow2.f32 %v1001_v40  ;;  %v1228_v40 = vld [vmem:[%s1624_s1] sm:$0xff]  }
 0x3b3   :  { %v1253_v39 = vpop.eup %1252 }
 0x3b4   :  { %232 = vrot.lane.b32.xlu0 %v1253_v39, %s1310_s24 }
 0x3b5   :  { %v1255_v41 = vpop.eup %1254 }
 0x3b6   :  { %v226_v42 = vadd.f32 1.0, %v1255_v41  ;;  %v1229_v41 = vld [vmem:[%s1624_s1 + $0x8] sm:$0xff]  }
 0x3b8   :  { %1256 = vrcp.f32 %v226_v42  ;;  %v1230_v42 = vld [vmem:[%s1624_s1 + $0x10] sm:$0xff]  }
 0x3c2   :  { %v1257_v43 = vpop.eup %1256 }
 0x3c3   :  { %v230_v46 = vmul.f32 %v1257_v43, %v119_v22 }
 0x426   :  { %v233_v44 = vpop.permute.xlu0 %232 }
 0x427   :  { %v235_v45 = vmul.f32 %v1257_v43, %v233_v44  ;;  %v1231_v44 = vld [vmem:[%s1624_s1 + $0x18] sm:$0xff]  }
 0x429   :  { %237 = vrot.lane.b32.xlu1 %v235_v45, %s1311_s2 }
 0x49b   :  { %v238_v47 = vpop.permute.xlu1 %237 }
 0x49c   :  { %v240_v48 = vadd.f32 %v238_v47, %v230_v46 }
 0x49e   :  { %1258 = vtanh.f32 %v240_v48 }
 0x4a8   :  { %v1259_v52 = vpop.eup %1258 }
 0x4a9   :  { %243 = vrot.lane.b32.xlu0 %v1259_v52, %s1310_s24 }
 0x51b   :  { %v244_v54 = vpop.permute.xlu0 %243 }
 0x51c   :  { %v246_v55 = vmul.f32 %v1257_v43, %v244_v54 }
 0x51e   :  { %v1417_v56 = vpack.c.bf16 %v246_v55, %v246_v55 }
 0x520   :  { %258 = vrot.lane.b32.xlu1 %v1417_v56, %s1310_s24 }
 0x592   :  { %v259_v58 = vpop.permute.xlu1 %258 }
 0x593   :  { %v262_v59 = vsel %vm16_vm1, %v1004_v57, %v259_v58 }
 0x594   :  { %1145 = vmatmul.mubr.msk.bf16.vlgmr.msra.gmra.mrb[4].mxu0 %vm59_vm2, %v262_v59 }
 0x595   :  { %1168 = vmatprep.mubr.msk.bf16.mxu0 %vm1309_vm0, %v1308_v0  ;;  %1161 = vmatpush3.bf16.msra.mxu0 %v1228_v40 }
 0x596   :  { %1162 = vmatprep.subr.bf16.mxu0 %v1308_v0 }
 0x599   :  { %1163 = vmatpush3.bf16.msra.mxu0 %v1229_v41  ;;  %v1044_v41 = vld [vmem:[%s1625_s0 + $0x18] sm:$0xf] }
 0x59a   :  { %1164 = vmatprep.subr.bf16.mxu0 %v1308_v0 }
 0x59d   :  { %1165 = vmatpush3.bf16.msra.mxu0 %v1230_v42 }
 0x59e   :  { %1166 = vmatprep.subr.bf16.mxu0 %v1308_v0 }
 0x5a1   :  { %1167 = vmatpush3.bf16.msra.mxu0 %v1231_v44 }
 0x5a2   :  { %1184 = vmatprep.subr.bf16.mxu0 %v1308_v0 }
 0x667   :  { %v338_v60 = vpop.f32.mrb[4].mxu0 }
 0x668   :  { %v339_v61 = vadd.f32 %v1364_v7, %v338_v60  ;;  %v1146_v62 = vpop.f32.mrb[5].mxu0 }
 0x669   :  { %v341_v63 = vpop.f32.mrb[6].mxu0 }
 0x66a   :  { %1260 = vtanh.f32 %v339_v61  ;;  %v1147_v1 = vpop.f32.mrb[7].mxu0  ;;  %v1011_v3 = vmul.f32 -1.442695, %v339_v61 }
 0x66c   :  { %1262 = vpow2.f32 %v1011_v3 }
 0x674   :  { %v1261_v2 = vpop.eup %1260 }
 0x675   :  { %353 = vrot.lane.b32.xlu0 %v1261_v2, %s1310_s24 }
 0x676   :  { %v1263_v4 = vpop.eup %1262 }
 0x677   :  { %v347_v5 = vadd.f32 1.0, %v1263_v4  ;;  %v1232_v4 = vld [vmem:[%s1624_s1] sm:$0xff]  }
 0x679   :  { %1264 = vrcp.f32 %v347_v5  ;;  %v1233_v5 = vld [vmem:[%s1624_s1 + $0x8] sm:$0xff]  }
 0x683   :  { %v1265_v6 = vpop.eup %1264 }
 0x684   :  { %v351_v10 = vmul.f32 %v1265_v6, %v240_v48  ;;  %v1024_v48 = vld [vmem:[%s1625_s0 + $0x10] sm:$0xf] }
 0x6e7   :  { %v354_v8 = vpop.permute.xlu0 %353 }
 0x6e8   :  { %v356_v9 = vmul.f32 %v1265_v6, %v354_v8 }
 0x6ea   :  { %358 = vrot.lane.b32.xlu1 %v356_v9, %s1311_s2  ;;  %v1235_v9 = vld [vmem:[%s1624_s1 + $0x18] sm:$0xff]  }
 0x75c   :  { %v359_v11 = vpop.permute.xlu1 %358 }
 0x75d   :  { %v361_v12 = vadd.f32 %v359_v11, %v351_v10 }
 0x75f   :  { %1266 = vtanh.f32 %v361_v12 }
 0x769   :  { %v1267_v16 = vpop.eup %1266 }
 0x76a   :  { %364 = vrot.lane.b32.xlu0 %v1267_v16, %s1310_s24 }
 0x7dc   :  { %v365_v18 = vpop.permute.xlu0 %364 }
 0x7dd   :  { %v367_v19 = vmul.f32 %v1265_v6, %v365_v18  ;;  %v1234_v6 = vld [vmem:[%s1624_s1 + $0x10] sm:$0xff]  }
 0x7df   :  { %v1448_v20 = vpack.c.bf16 %v367_v19, %v367_v19 }
 0x7e1   :  { %379 = vrot.lane.b32.xlu1 %v1448_v20, %s1310_s24 }
 0x853   :  { %v380_v22 = vpop.permute.xlu1 %379 }
 0x854   :  { %v383_v23 = vsel %vm16_vm1, %v1014_v21, %v380_v22 }
 0x855   :  { %1157 = vmatmul.mubr.msk.bf16.vlgmr.msra.gmra.mrb[4].mxu1 %vm59_vm2, %v383_v23 }
 0x856   :  { %1180 = vmatprep.mubr.msk.bf16.mxu1 %vm1309_vm0, %v1308_v0  ;;  %1173 = vmatpush3.bf16.msra.mxu1 %v1232_v4 }
 0x857   :  { %1174 = vmatprep.subr.bf16.mxu1 %v1308_v0 }
 0x85a   :  { %1175 = vmatpush3.bf16.msra.mxu1 %v1233_v5 }
 0x85b   :  { %1176 = vmatprep.subr.bf16.mxu1 %v1308_v0 }
 0x85e   :  { %1177 = vmatpush3.bf16.msra.mxu1 %v1234_v6  ;;  %v1054_v6 = vld [vmem:[%s1625_s0 + $0x1c] sm:$0xf] }
 0x85f   :  { %1178 = vmatprep.subr.bf16.mxu1 %v1308_v0 }
 0x862   :  { %1179 = vmatpush3.bf16.msra.mxu1 %v1235_v9 }
 0x863   :  { %1196 = vmatprep.subr.bf16.mxu1 %v1308_v0 }
 0x928   :  { %v459_v24 = vpop.f32.mrb[4].mxu1 }
 0x929   :  { %v460_v25 = vadd.f32 %v1364_v7, %v459_v24  ;;  %v1158_v26 = vpop.f32.mrb[5].mxu1 }
 0x92a   :  { %v462_v27 = vpop.f32.mrb[6].mxu1 }
 0x92b   :  { %1268 = vtanh.f32 %v460_v25  ;;  %v1159_v28 = vpop.f32.mrb[7].mxu1  ;;  %v1021_v31 = vmul.f32 -1.442695, %v460_v25 }
 0x92d   :  { %1270 = vpow2.f32 %v1021_v31 }
 0x935   :  { %v1269_v29 = vpop.eup %1268 }
 0x936   :  { %474 = vrot.lane.b32.xlu0 %v1269_v29, %s1310_s24 }
 0x937   :  { %v1271_v32 = vpop.eup %1270 }
 0x938   :  { %v468_v33 = vadd.f32 1.0, %v1271_v32 }
 0x93a   :  { %1272 = vrcp.f32 %v468_v33  ;;  %v1236_v33 = vld [vmem:[%s1624_s1] sm:$0xff]  }
 0x944   :  { %v1273_v34 = vpop.eup %1272 }
 0x945   :  { %v472_v37 = vmul.f32 %v1273_v34, %v361_v12 }
 0x9a8   :  { %v475_v35 = vpop.permute.xlu0 %474 }
 0x9a9   :  { %v477_v36 = vmul.f32 %v1273_v34, %v475_v35  ;;  %v1238_v35 = vld [vmem:[%s1624_s1 + $0x10] sm:$0xff]  }
 0x9ab   :  { %479 = vrot.lane.b32.xlu1 %v477_v36, %s1311_s2 }
 0xa1d   :  { %v480_v38 = vpop.permute.xlu1 %479 }
 0xa1e   :  { %v482_v39 = vadd.f32 %v480_v38, %v472_v37  ;;  %v1239_v37 = vld [vmem:[%s1624_s1 + $0x18] sm:$0xff]  }
 0xa20   :  { %1274 = vtanh.f32 %v482_v39 }
 0xa2a   :  { %v1275_v43 = vpop.eup %1274 }
 0xa2b   :  { %485 = vrot.lane.b32.xlu0 %v1275_v43, %s1310_s24 }
 0xa9d   :  { %v486_v45 = vpop.permute.xlu0 %485 }
 0xa9e   :  { %v488_v46 = vmul.f32 %v1273_v34, %v486_v45  ;;  %v1237_v34 = vld [vmem:[%s1624_s1 + $0x8] sm:$0xff]  }
 0xaa0   :  { %v1479_v47 = vpack.c.bf16 %v488_v46, %v488_v46 }
 0xaa2   :  { %500 = vrot.lane.b32.xlu1 %v1479_v47, %s1310_s24 }
 0xb14   :  { %v501_v49 = vpop.permute.xlu1 %500 }
 0xb15   :  { %v504_v50 = vsel %vm16_vm1, %v1024_v48, %v501_v49 }
 0xb16   :  { %1169 = vmatmul.mubr.msk.bf16.vlgmr.msra.gmra.mrb[8].mxu0 %vm59_vm2, %v504_v50 }
 0xb17   :  { %1192 = vmatprep.mubr.msk.bf16.mxu0 %vm1309_vm0, %v1308_v0  ;;  %1185 = vmatpush3.bf16.msra.mxu0 %v1236_v33 }
 0xb18   :  { %1186 = vmatprep.subr.bf16.mxu0 %v1308_v0 }
 0xb1b   :  { %1187 = vmatpush3.bf16.msra.mxu0 %v1237_v34 }
 0xb1c   :  { %1188 = vmatprep.subr.bf16.mxu0 %v1308_v0 }
 0xb1f   :  { %1189 = vmatpush3.bf16.msra.mxu0 %v1238_v35 }
 0xb20   :  { %1190 = vmatprep.subr.bf16.mxu0 %v1308_v0 }
 0xb23   :  { %1191 = vmatpush3.bf16.msra.mxu0 %v1239_v37 }
 0xbe9   :  { %v580_v51 = vpop.f32.mrb[8].mxu0 }
 0xbea   :  { %v581_v52 = vadd.f32 %v1364_v7, %v580_v51  ;;  %v1170_v53 = vpop.f32.mrb[9].mxu0 }
 0xbeb   :  { %v583_v54 = vpop.f32.mrb[10].mxu0 }
 0xbec   :  { %1276 = vtanh.f32 %v581_v52  ;;  %v1171_v55 = vpop.f32.mrb[11].mxu0  ;;  %v1031_v58 = vmul.f32 -1.442695, %v581_v52 }
 0xbee   :  { %1278 = vpow2.f32 %v1031_v58 }
 0xbf6   :  { %v1277_v57 = vpop.eup %1276 }
 0xbf7   :  { %595 = vrot.lane.b32.xlu0 %v1277_v57, %s1310_s24 }
 0xbf8   :  { %v1279_v59 = vpop.eup %1278 }
 0xbf9   :  { %v589_v60 = vadd.f32 1.0, %v1279_v59 }
 0xbfb   :  { %1280 = vrcp.f32 %v589_v60 }
 0xc05   :  { %v1281_v61 = vpop.eup %1280 }
 0xc06   :  { %v593_v1 = vmul.f32 %v1281_v61, %v482_v39 }
 0xc69   :  { %v596_v62 = vpop.permute.xlu0 %595 }
 0xc6a   :  { %v598_v63 = vmul.f32 %v1281_v61, %v596_v62  ;;  %v1241_v62 = vld [vmem:[%s1624_s1 + $0x8] sm:$0xff]  }
 0xc6c   :  { %600 = vrot.lane.b32.xlu1 %v598_v63, %s1311_s2  ;;  %v1242_v63 = vld [vmem:[%s1624_s1 + $0x10] sm:$0xff]  }
 0xcde   :  { %v601_v2 = vpop.permute.xlu1 %600 }
 0xcdf   :  { %v603_v3 = vadd.f32 %v601_v2, %v593_v1  ;;  %v1243_v2 = vld [vmem:[%s1624_s1 + $0x18] sm:$0xff]  }
 0xce1   :  { %1282 = vtanh.f32 %v603_v3 }
 0xceb   :  { %v1283_v8 = vpop.eup %1282 }
 0xcec   :  { %606 = vrot.lane.b32.xlu0 %v1283_v8, %s1310_s24 }
 0xd5e   :  { %v607_v10 = vpop.permute.xlu0 %606 }
 0xd5f   :  { %v609_v11 = vmul.f32 %v1281_v61, %v607_v10  ;;  %v1240_v61 = vld [vmem:[%s1624_s1] sm:$0xff]  }
 0xd61   :  { %v1510_v12 = vpack.c.bf16 %v609_v11, %v609_v11 }
 0xd63   :  { %621 = vrot.lane.b32.xlu1 %v1510_v12, %s1310_s24 }
 0xdd5   :  { %v622_v14 = vpop.permute.xlu1 %621 }
 0xdd6   :  { %v625_v15 = vsel %vm16_vm1, %v1034_v13, %v622_v14 }
 0xdd7   :  { %1181 = vmatmul.mubr.msk.bf16.vlgmr.msra.gmra.mrb[8].mxu1 %vm59_vm2, %v625_v15 }
 0xdd8   :  { %1204 = vmatprep.mubr.msk.bf16.mxu1 %vm1309_vm0, %v1308_v0  ;;  %1197 = vmatpush3.bf16.msra.mxu1 %v1240_v61 }
 0xdd9   :  { %1198 = vmatprep.subr.bf16.mxu1 %v1308_v0 }
 0xddc   :  { %1199 = vmatpush3.bf16.msra.mxu1 %v1241_v62 }
 0xddd   :  { %1200 = vmatprep.subr.bf16.mxu1 %v1308_v0 }
 0xde0   :  { %1201 = vmatpush3.bf16.msra.mxu1 %v1242_v63 }
 0xde1   :  { %1202 = vmatprep.subr.bf16.mxu1 %v1308_v0 }
 0xde4   :  { %1203 = vmatpush3.bf16.msra.mxu1 %v1243_v2 }
 0xeaa   :  { %v701_v16 = vpop.f32.mrb[8].mxu1 }
 0xeab   :  { %v702_v17 = vadd.f32 %v1364_v7, %v701_v16  ;;  %v1182_v18 = vpop.f32.mrb[9].mxu1 }
 0xeac   :  { %v704_v19 = vpop.f32.mrb[10].mxu1 }
 0xead   :  { %1284 = vtanh.f32 %v702_v17  ;;  %v1183_v21 = vpop.f32.mrb[11].mxu1  ;;  %v1041_v23 = vmul.f32 -1.442695, %v702_v17 }
 0xeaf   :  { %1286 = vpow2.f32 %v1041_v23 }
 0xeb7   :  { %v1285_v22 = vpop.eup %1284 }
 0xeb8   :  { %716 = vrot.lane.b32.xlu0 %v1285_v22, %s1310_s24 }
 0xeb9   :  { %v1287_v24 = vpop.eup %1286 }
 0xeba   :  { %v710_v25 = vadd.f32 1.0, %v1287_v24 }
 0xebc   :  { %1288 = vrcp.f32 %v710_v25 }
 0xec6   :  { %v1289_v26 = vpop.eup %1288 }
 0xec7   :  { %v714_v29 = vmul.f32 %v1289_v26, %v603_v3 }
 0xf2a   :  { %v717_v27 = vpop.permute.xlu0 %716 }
 0xf2b   :  { %v719_v28 = vmul.f32 %v1289_v26, %v717_v27 }
 0xf2d   :  { %721 = vrot.lane.b32.xlu1 %v719_v28, %s1311_s2 }
 0xf9f   :  { %v722_v31 = vpop.permute.xlu1 %721 }
 0xfa0   :  { %v724_v32 = vadd.f32 %v722_v31, %v714_v29 }
 0xfa2   :  { %1290 = vtanh.f32 %v724_v32 }
 0xfac   :  { %v1291_v36 = vpop.eup %1290 }
 0xfad   :  { %727 = vrot.lane.b32.xlu0 %v1291_v36, %s1310_s24 }
0x101f   :  { %v728_v38 = vpop.permute.xlu0 %727 }
0x1020   :  { %v730_v39 = vmul.f32 %v1289_v26, %v728_v38 }
0x1022   :  { %v1540_v40 = vpack.c.bf16 %v730_v39, %v730_v39 }
0x1024   :  { %742 = vrot.lane.b32.xlu1 %v1540_v40, %s1310_s24 }
0x1096   :  { %v743_v42 = vpop.permute.xlu1 %742 }
0x1097   :  { %v746_v43 = vsel %vm16_vm1, %v1044_v41, %v743_v42 }
0x1098   :  { %1193 = vmatmul.mubr.msk.bf16.vlgmr.msra.gmra.mrb[12].mxu0 %vm59_vm2, %v746_v43 }
0x116b   :  { %v822_v44 = vpop.f32.mrb[12].mxu0 }
0x116c   :  { %v823_v45 = vadd.f32 %v1364_v7, %v822_v44  ;;  %v1194_v46 = vpop.f32.mrb[13].mxu0 }
0x116d   :  { %v825_v48 = vpop.f32.mrb[14].mxu0 }
0x116e   :  { %1292 = vtanh.f32 %v823_v45  ;;  %v1195_v49 = vpop.f32.mrb[15].mxu0  ;;  %v1051_v51 = vmul.f32 -1.442695, %v823_v45 }
0x1170   :  { %1294 = vpow2.f32 %v1051_v51 }
0x1178   :  { %v1293_v50 = vpop.eup %1292 }
0x1179   :  { %837 = vrot.lane.b32.xlu0 %v1293_v50, %s1310_s24 }
0x117a   :  { %v1295_v52 = vpop.eup %1294 }
0x117b   :  { %v831_v53 = vadd.f32 1.0, %v1295_v52 }
0x117d   :  { %1296 = vrcp.f32 %v831_v53 }
0x1187   :  { %v1297_v54 = vpop.eup %1296 }
0x1188   :  { %v835_v58 = vmul.f32 %v1297_v54, %v724_v32 }
0x11eb   :  { %v838_v55 = vpop.permute.xlu0 %837 }
0x11ec   :  { %v840_v57 = vmul.f32 %v1297_v54, %v838_v55 }
0x11ee   :  { %842 = vrot.lane.b32.xlu1 %v840_v57, %s1311_s2 }
0x1260   :  { %v843_v59 = vpop.permute.xlu1 %842 }
0x1261   :  { %v845_v60 = vadd.f32 %v843_v59, %v835_v58 }
0x1263   :  { %1298 = vtanh.f32 %v845_v60 }
0x126d   :  { %v1299_v1 = vpop.eup %1298 }
0x126e   :  { %848 = vrot.lane.b32.xlu0 %v1299_v1, %s1310_s24 }
0x12e0   :  { %v849_v3 = vpop.permute.xlu0 %848 }
0x12e1   :  { %v851_v4 = vmul.f32 %v1297_v54, %v849_v3 }
0x12e3   :  { %v852_v5 = vpack.c.bf16 %v851_v4, %v851_v4 }
0x12e5   :  { %863 = vrot.lane.b32.xlu1 %v852_v5, %s1310_s24 }
0x1357   :  { %v864_v8 = vpop.permute.xlu1 %863 }
0x1358   :  { %v867_v9 = vsel %vm16_vm1, %v1054_v6, %v864_v8 }
0x1359   :  { %1205 = vmatmul.mubr.msk.bf16.vlgmr.msra.gmra.mrb[12].mxu1 %vm59_vm2, %v867_v9 }
0x142c   :  { %v943_v10 = vpop.f32.mrb[12].mxu1 }
0x142d   :  { %v944_v11 = vadd.f32 %v1364_v7, %v943_v10  ;;  %v1206_v13 = vpop.f32.mrb[13].mxu1 }
0x142e   :  { %v946_v0 = vpop.f32.mrb[14].mxu1 }
0x142f   :  { %1300 = vtanh.f32 %v944_v11  ;;  %v1207_v14 = vpop.f32.mrb[15].mxu1  ;;  %v1061_v16 = vmul.f32 -1.442695, %v944_v11 }
0x1431   :  { %1302 = vpow2.f32 %v1061_v16 }
0x1439   :  { %v1301_v15 = vpop.eup %1300 }
0x143a   :  { %958 = vrot.lane.b32.xlu0 %v1301_v15, %s1310_s24 }
0x143b   :  { %v1303_v17 = vpop.eup %1302 }
0x143c   :  { %v952_v18 = vadd.f32 1.0, %v1303_v17 }
0x143e   :  { %1304 = vrcp.f32 %v952_v18 }
0x1448   :  { %v1305_v19 = vpop.eup %1304 }
0x1449   :  { %v956_v7 = vmul.f32 %v1305_v19, %v845_v60 }
0x14ac   :  { %v959_v21 = vpop.permute.xlu0 %958 }
0x14ad   :  { %v961_v22 = vmul.f32 %v1305_v19, %v959_v21 }
0x14af   :  { %963 = vrot.lane.b32.xlu1 %v961_v22, %s1311_s2 }
0x14b3   :  { %130 = vrot.lane.b32.xlu1 %v1386_v30, %s1311_s2 }
0x14b7   :  { %372 = vrot.lane.b32.xlu1 %v1448_v20, %s1311_s2 }
0x14bb   :  { %614 = vrot.lane.b32.xlu1 %v1510_v12, %s1311_s2 }
0x14bf   :  { %856 = vrot.lane.b32.xlu1 %v852_v5, %s1311_s2 }
0x1521   :  { %v964_v23 = vpop.permute.xlu1 %963 }
0x1522   :  { %v966_v24 = vadd.f32 %v964_v23, %v956_v7 }
0x1524   :  { %1306 = vtanh.f32 %v966_v24 }
0x1525   :  { %v131_v25 = vpop.permute.xlu1 %130 }
0x1526   :  { %134 = vst.msk [vmem:[%s1627_s3] sm:$0xf] %vm133_vm3, %v131_v25 }
0x1529   :  { %v373_v30 = vpop.permute.xlu1 %372 }
0x152a   :  { %1013 = vst.msk [vmem:[%s1627_s3 + $0x8] sm:$0xf] %vm133_vm3, %v373_v30 }
0x152d   :  { %v615_v20 = vpop.permute.xlu1 %614 }
0x152e   :  { %v1307_v12 = vpop.eup %1306  ;;  %1033 = vst.msk [vmem:[%s1627_s3 + $0x10] sm:$0xf] %vm133_vm3, %v615_v20 }
0x152f   :  { %969 = vrot.lane.b32.xlu0 %v1307_v12, %s1310_s24 }
0x1531   :  { %v857_v26 = vpop.permute.xlu1 %856 }
0x1532   :  { %1053 = vst.msk [vmem:[%s1627_s3 + $0x18] sm:$0xf] %vm133_vm3, %v857_v26 }
0x1533   :  { %251 = vrot.lane.b32.xlu0 %v1417_v56, %s1311_s2 }
0x1537   :  { %493 = vrot.lane.b32.xlu0 %v1479_v47, %s1311_s2 }
0x153b   :  { %735 = vrot.lane.b32.xlu0 %v1540_v40, %s1311_s2 }
0x15a1   :  { %v970_v27 = vpop.permute.xlu0 %969 }
0x15a2   :  { %v972_v28 = vmul.f32 %v1305_v19, %v970_v27 }
0x15a4   :  { %v1071_v29 = vpack.c.bf16 %v972_v28, %v972_v28 }
0x15a5   :  { %v252_v31 = vpop.permute.xlu0 %251 }
0x15a6   :  { %1003 = vst.msk [vmem:[%s1627_s3 + $0x4] sm:$0xf] %vm133_vm3, %v252_v31  ;;  %977 = vrot.lane.b32.xlu0 %v1071_v29, %s1311_s2 }
0x15a9   :  { %v494_v32 = vpop.permute.xlu0 %493 }
0x15aa   :  { %1023 = vst.msk [vmem:[%s1627_s3 + $0xc] sm:$0xf] %vm133_vm3, %v494_v32 }
0x15ad   :  { %v736_v56 = vpop.permute.xlu0 %735 }
0x15ae   :  { %1043 = vst.msk [vmem:[%s1627_s3 + $0x14] sm:$0xf] %vm133_vm3, %v736_v56 }
0x1618   :  { %v978_v47 = vpop.permute.xlu0 %977 }
0x1619   :  { %1063 = vst.msk [vmem:[%s1627_s3 + $0x1c] sm:$0xf] %vm133_vm3, %v978_v47 }

</bundles_post_ra>
